<compile_context>
chip_gen: v6e
topology: v6e:2x2x1
jax: 0.10.0
libtpu: 0.0.40
codegen_flags: <defaults>
</compile_context>

<pallas_src>
import jax
import jax.numpy as jnp
from jax.experimental import pallas as pl
from jax.experimental.pallas import tpu as pltpu

_LANES = 128
_MAX_BLOCK_ROWS = 1024  # (1024, 128) f32 tile = 512 KiB per plane


def _three_point_ten_kernel(coef_ref, x0_ref, x1_ref, y_ref):
    # coef_ref: SMEM (3,) f32 = [a0, a1, c]  (folded affine coefficients)
    a0 = coef_ref[0]
    a1 = coef_ref[1]
    c = coef_ref[2]
    # Two VPU broadcast-FMAs + EUP sigmoid per element; lane-dense in/out.
    z = x0_ref[...] * a0 + x1_ref[...] * a1 + c
    y_ref[...] = jax.nn.sigmoid(z)


def three_point_ten(x, w1, b1, w2, b2):
    """x: (B, 2) -> (B, 1) float32. Same math as sigmoid(fc2(fc1(x)))."""
    B = x.shape[0]

    # ---- Wrapper-side fold of the two Linear layers into one affine op ----
    # z = (x @ W1.T + b1) @ W2.T + b2 = x @ (W2 @ W1).T + (W2 @ b1 + b2)
    a = (w2.astype(jnp.float32) @ w1.astype(jnp.float32)).reshape(-1)      # (2,)
    c = (w2.astype(jnp.float32) @ b1.astype(jnp.float32)
         + b2.astype(jnp.float32)).reshape(-1)                             # (1,)
    coef = jnp.concatenate([a, c]).astype(jnp.float32)                     # (3,)

    # ---- Lane-dense layout: batch -> (rows, 128) planes per feature ----
    rows_raw = -(-B // _LANES)  # ceil(B / 128)
    if rows_raw <= _MAX_BLOCK_ROWS:
        block_rows = rows_raw           # single full-array block (any row count ok)
        rows = rows_raw
    else:
        block_rows = _MAX_BLOCK_ROWS    # multiple of 8 -> valid tiled block
        rows = -(-rows_raw // block_rows) * block_rows
    Bp = rows * _LANES
    pad = Bp - B

    xf = x.astype(jnp.float32)
    x0 = jnp.pad(xf[:, 0], (0, pad)).reshape(rows, _LANES)
    x1 = jnp.pad(xf[:, 1], (0, pad)).reshape(rows, _LANES)

    grid = (rows // block_rows,)
    plane_spec = pl.BlockSpec((block_rows, _LANES), lambda i, coef: (i, 0))

    y_planes = pl.pallas_call(
        _three_point_ten_kernel,
        out_shape=jax.ShapeDtypeStruct((rows, _LANES), jnp.float32),
        grid_spec=pltpu.PrefetchScalarGridSpec(
            num_scalar_prefetch=1,          # coef -> SMEM, passed first to kernel
            grid=grid,
            in_specs=[plane_spec, plane_spec],
            out_specs=plane_spec,
        ),
        compiler_params=pltpu.CompilerParams(
            dimension_semantics=("parallel",),
        ),
        cost_estimate=pl.CostEstimate(
            flops=5 * Bp,                   # 2 mul + 2 add + sigmoid add-ish
            transcendentals=Bp,             # one exp per element
            bytes_accessed=3 * 4 * Bp,      # x0 + x1 in, y out (f32)
        ),
    )(coef, x0, x1)

    # Back to the module's (B, 1) output shape.
    return y_planes.reshape(Bp)[:B].reshape(B, 1)


def init_params(key):
    """PyTorch nn.Linear-style init: U(-k, k), k = 1/sqrt(fan_in)."""
    k1, k2, k3, k4 = jax.random.split(key, 4)
    bound = 1.0 / jnp.sqrt(2.0)
    w1 = jax.random.uniform(k1, (2, 2), jnp.float32, -bound, bound)
    b1 = jax.random.uniform(k2, (2,), jnp.float32, -bound, bound)
    w2 = jax.random.uniform(k3, (1, 2), jnp.float32, -bound, bound)
    b2 = jax.random.uniform(k4, (1,), jnp.float32, -bound, bound)
    return w1, b1, w2, b2


def _reference(x, w1, b1, w2, b2):
    h = x @ w1.T + b1
    return jax.nn.sigmoid(h @ w2.T + b2)


if __name__ == "__main__":
    key = jax.random.PRNGKey(0)
    pkey, xkey, xkey2 = jax.random.split(key, 3)
    w1, b1, w2, b2 = init_params(pkey)

    # Small batch consistent with Linear(2, ...)
    x = jax.random.normal(xkey, (8, 2), jnp.float32)
    y = jax.block_until_ready(three_point_ten(x, w1, b1, w2, b2))
    y_ref = _reference(x, w1, b1, w2, b2)
    assert y.shape == (8, 1)
    assert jnp.allclose(y, y_ref, atol=1e-5, rtol=1e-5)

    # Extra check: batch not a multiple of 128 exercises the padding path.
    x2 = jax.random.normal(xkey2, (300, 2), jnp.float32)
    y2 = jax.block_until_ready(three_point_ten(x2, w1, b1, w2, b2))
    y2_ref = _reference(x2, w1, b1, w2, b2)
    assert y2.shape == (300, 1)
    assert jnp.allclose(y2, y2_ref, atol=1e-5, rtol=1e-5)

    print("KERNEL_OK")
</pallas_src>

<mosaic_0001>
module attributes {stable_mosaic.version = 11 : i64} {
  func.func @_three_point_ten_kernel(%arg0: i32, %arg1: memref<3xf32, #tpu.memory_space<smem>>, %arg2: memref<1x128xf32, #tpu.memory_space<vmem>>, %arg3: memref<1x128xf32, #tpu.memory_space<vmem>>, %arg4: memref<1x128xf32, #tpu.memory_space<vmem>>) attributes {dimension_semantics = [#tpu.dimension_semantics<parallel>], iteration_bounds = array<i64: 1>, scalar_prefetch = 1 : i64, scratch_operands = 0 : i64, tpu.core_type = #tpu.core_type<tc>, window_params = [{transform_indices = @transform_0, window_bounds = array<i64: 1, 128>}, {transform_indices = @transform_1, window_bounds = array<i64: 1, 128>}, {transform_indices = @transform_2, window_bounds = array<i64: 1, 128>}]} {
    %c0 = arith.constant 0 : index
    %0 = memref.load %arg1[%c0] : memref<3xf32, #tpu.memory_space<smem>>
    %c1 = arith.constant 1 : index
    %1 = memref.load %arg1[%c1] : memref<3xf32, #tpu.memory_space<smem>>
    %c2 = arith.constant 2 : index
    %2 = memref.load %arg1[%c2] : memref<3xf32, #tpu.memory_space<smem>>
    %c0_0 = arith.constant 0 : index
    %c0_1 = arith.constant 0 : index
    %3 = vector.load %arg2[%c0_0, %c0_1] : memref<1x128xf32, #tpu.memory_space<vmem>>, vector<1x128xf32>
    %4 = vector.broadcast %0 : f32 to vector<1x128xf32>
    %5 = arith.mulf %3, %4 : vector<1x128xf32>
    %c0_2 = arith.constant 0 : index
    %c0_3 = arith.constant 0 : index
    %6 = vector.load %arg3[%c0_2, %c0_3] : memref<1x128xf32, #tpu.memory_space<vmem>>, vector<1x128xf32>
    %7 = vector.broadcast %1 : f32 to vector<1x128xf32>
    %8 = arith.mulf %6, %7 : vector<1x128xf32>
    %9 = arith.addf %5, %8 : vector<1x128xf32>
    %10 = vector.broadcast %2 : f32 to vector<1x128xf32>
    %11 = arith.addf %9, %10 : vector<1x128xf32>
    %12 = arith.negf %11 : vector<1x128xf32>
    %13 = math.exp %12 : vector<1x128xf32>
    %cst = arith.constant 1.000000e+00 : f32
    %14 = vector.broadcast %cst : f32 to vector<1x128xf32>
    %15 = arith.addf %14, %13 : vector<1x128xf32>
    %16 = arith.divf %14, %15 : vector<1x128xf32>
    %c0_4 = arith.constant 0 : index
    %c0_5 = arith.constant 0 : index
    %17 = vector.load %arg4[%c0_4, %c0_5] : memref<1x128xf32, #tpu.memory_space<vmem>>, vector<1x128xf32>
    tpu.vector_store %arg4[%c0_4, %c0_5], %16 {strides = array<i32>} : memref<1x128xf32, #tpu.memory_space<vmem>>, vector<1x128xf32>,
    return
  }
  func.func @transform_0(%arg0: i32, %arg1: memref<3xf32, #tpu.memory_space<smem>>) -> (i32, i32) {
    %c0_i32 = arith.constant 0 : i32
    %c0_i32_0 = arith.constant 0 : i32
    return %arg0, %c0_i32 : i32, i32
  }
  func.func @transform_1(%arg0: i32, %arg1: memref<3xf32, #tpu.memory_space<smem>>) -> (i32, i32) {
    %c0_i32 = arith.constant 0 : i32
    %c0_i32_0 = arith.constant 0 : i32
    return %arg0, %c0_i32 : i32, i32
  }
  func.func @transform_2(%arg0: i32, %arg1: memref<3xf32, #tpu.memory_space<smem>>) -> (i32, i32) {
    %c0_i32 = arith.constant 0 : i32
    %c0_i32_0 = arith.constant 0 : i32
    return %arg0, %c0_i32 : i32, i32
  }
}

</mosaic_0001>

<bundles_post_ra>
// kernel: tpu_custom_call.1
= control target key start
LH: loop header
LB: loop body
LE: loop exit
PB: predicated region body
PF: predicated region fallthrough
CT: control target
= control target key end

     0   :  { %s91_s12 = smov [#allocation3]   ;;  %s125_s0 = inlined_call_operand.hbm [shape: f32[3], index: 0, kind: input, shape index: {}]   ;;  %s126_s1 = inlined_call_operand.vmem [shape: f32[1,128], index: 1, kind: input, shape index: {}]   ;;  %s127_s2 = inlined_call_operand.vmem [shape: f32[1,128], index: 2, kind: input, shape index: {}]   ;;  %s128_s3 = inlined_call_operand.hbm [shape: f32[1,128], index: 3, kind: output, shape index: {}]  }
   0x1   :  { %9 = dma.hbm_to_smem %s125_s0, 16, %s91_s12, [#allocation2] }
   0x2   :  { %87 = dma.done.wait [#allocation2], 16 }
   0x3   :  { %88 = vsyncadd [#allocation2], 4294967280 }
   0x4   :  { %11 = sfence }
   0x5   :  { %s17_s15 = sld [smem:[#allocation3]] }
   0x6   :  { %s50_s16 = sld [smem:[#allocation3 + $0x1]] }
   0x7   :  { %12 = vsyncpa [#allocation5], 0  ;;  %s51_s17 = sld [smem:[#allocation3 + $0x2]]  ;;  %v20_v0 = vld [vmem:[%s126_s1] sm:$0x1]  ;;  %s92_s0 = smov [#allocation4]  }
   0x8   :  { %v23_v1 = vld [vmem:[%s127_s2] sm:$0x1]  ;;  %s42_s22 = sshll.u32 %s92_s0, 4  ;;  %s43_s22 = int_to_ptr.vmem [resolvable:$true] %s42_s22 }
   0x9   :  { %s67_s1 = scalar_lea.vmem %s43_s22, 16  ;;  %s71_s2 = scalar_lea.vmem %s43_s22, 32 }
   0xa   :  { %p68_p0 = scmp.ne.s32.totalorder %s43_s22, %s67_s1  ;;  %p72_p1 = scmp.lt.s32.totalorder %s43_s22, %s43_s22 }
   0xb   :  { %v21_v2 = vstv %s17_s15  ;;  %p73_p2 = scmp.lt.s32.totalorder %s71_s2, %s67_s1 }
   0xc   :  { %v22_v3 = vmul.f32 %v21_v2, %v20_v0  ;;  %v24_v4 = vstv %s50_s16 }
   0xd   :  { %v25_v5 = vmul.f32 %v24_v4, %v23_v1  ;;  %v27_v6 = vstv %s51_s17  ;;  %p74_p3 = por %p73_p2, %p72_p1 }
   0xf   :  { %v26_v7 = vadd.f32 %v25_v5, %v22_v3  ;;  %p75_p4 = pnand %p74_p3, %p68_p0 }
  0x11   :  { %v28_v8 = vadd.f32 %v27_v6, %v26_v7 }
  0x13   :  { %v52_v9 = vmul.f32 -1.442695, %v28_v8 }
  0x15   :  { %55 = vpow2.f32 %v52_v9 }
  0x22   :  { %v56_v10 = vpop.eup %55 }
  0x23   :  { %v32_v11 = vadd.f32 1.0, %v56_v10 }
  0x25   :  { %57 = vrcp.f32 %v32_v11 }
  0x32   :  { %v58_v12 = vpop.eup %57 }
  0x33   :  { %35 = vst [vmem:[#allocation4] sm:$0x1] %v58_v12 }
  0x34   :  { %78 = shalt.err (!%p75_p4)
}
  0x35   :  { %45 = dma.vmem_to_hbm [thread:$0]  %s43_s22, 16, %s128_s3, [#allocation5]  }
  0x36   :  { %89 = dma.done.wait [#allocation5], 16  }
  0x37   :  { %90 = vsyncadd [#allocation5], 4294967280 }
  0x38   :  { %49 = vsyncpa [#allocation5], 1 }

</bundles_post_ra>
